<compile_context>
chip_gen: v5e
topology: v5e:2x2
jax: 0.10.0
libtpu: 0.0.40
codegen_flags: <defaults>
</compile_context>

<pallas_src>
import numpy as np
import jax
import jax.numpy as jnp
from jax.experimental import pallas as pl
from jax.experimental.pallas import tpu as pltpu


def _round_up(x, m):
    return (x + m - 1) // m * m


def _pick_vmem_limit():
    # Generation-aware scoped-VMEM limit: big tiles on v5e/v6e (128 MiB physical), modest on
    # v7x (64 MiB physical).  Falls back to the conservative 32 MiB that is safe everywhere.
    try:
        cap = int(pltpu.get_tpu_info().vmem_capacity_bytes)
        return max(16 << 20, min(cap - (16 << 20), 96 << 20))
    except Exception:
        return 32 << 20


# ---------------- Pass 1: tiled GEMM + per-channel sum / sum-of-squares ----------------
def _conv_stats_kernel(p_ref, w_ref, y_ref, sum_ref, ssq_ref, acc_ref, sum8_ref, ssq8_ref):
    # grid = (n: Cout tiles, m: M tiles, k: K tiles), k innermost ("arbitrary" reduction).
    # p_ref: (block_m, tk)  w_ref: (tk, tn)  y_ref: (block_m, tn)
    # sum_ref / ssq_ref: (1, tn) outputs, resident across (m, k) for the current n.
    # acc_ref: (block_m, tn) f32 scratch.  sum8/ssq8: (8, tn) f32 sublane-folded partials.
    m = pl.program_id(1)
    k = pl.program_id(2)
    last_m = pl.num_programs(1) - 1
    last_k = pl.num_programs(2) - 1

    @pl.when(k == 0)
    def _():
        acc_ref[...] = jnp.zeros_like(acc_ref)

    @pl.when(jnp.logical_and(m == 0, k == 0))
    def _():
        sum8_ref[...] = jnp.zeros_like(sum8_ref)
        ssq8_ref[...] = jnp.zeros_like(ssq8_ref)

    acc_ref[...] += jnp.dot(p_ref[...], w_ref[...], preferred_element_type=jnp.float32)  # MXU

    @pl.when(k == last_k)
    def _():
        y = acc_ref[...]
        y_ref[...] = y.astype(y_ref.dtype)
        bm, bn = y.shape
        yf = y.reshape(bm // 8, 8, bn)          # fold rows into sublanes: VPU-only adds
        sum8_ref[...] += jnp.sum(yf, axis=0)
        ssq8_ref[...] += jnp.sum(yf * yf, axis=0)

    @pl.when(jnp.logical_and(m == last_m, k == last_k))
    def _():
        # One cross-sublane reduce + (1, tn) store per Cout tile.
        sum_ref[...] = jnp.sum(sum8_ref[...], axis=0, keepdims=True)
        ssq_ref[...] = jnp.sum(ssq8_ref[...], axis=0, keepdims=True)


# ---------------- Pass 2: fused BN-normalize + affine + MulShift ----------------
def _bn_apply_kernel(scale_ref, shift_ref, y_ref, o_ref):
    # scale_ref / shift_ref: (1, Cp)   y_ref / o_ref: (block_m2, Cp)
    o_ref[...] = y_ref[...].astype(jnp.float32) * scale_ref[...] + shift_ref[...]


def conv_bn_forward(x, weight, bias, gamma, beta, *, stride=1, padding=0, dilation=1,
                    scale=1.0, ms_bias=0.0, fl=0.0, eps=1e-5,
                    block_m=512, block_k=512, block_n=512,
                    matmul_dtype=jnp.bfloat16, nhwc_out=False):
    """x: (N, Cin, H, W) NCHW.  weight: (Cout, Cin, kh, kw) OIHW.  Returns NCHW (or NHWC)."""
    del bias  # exactly cancelled by training-mode BatchNorm mean subtraction (see header)

    N, Cin, H, W = x.shape
    Cout, _, kh, kw = weight.shape
    Ho = (H + 2 * padding - dilation * (kh - 1) - 1) // stride + 1
    Wo = (W + 2 * padding - dilation * (kw - 1) - 1) // stride + 1
    M = N * Ho * Wo
    K = Cin * kh * kw

    matmul_is_f32 = np.dtype(matmul_dtype) == np.dtype(jnp.float32)
    y_dtype = jnp.float32 if matmul_is_f32 else jnp.bfloat16

    # --- JAX glue: NHWC im2col (gather/stack only; produced directly in matmul dtype,
    #     (M, K) layout with Cin-major / (kh,kw)-minor K -> matches weight.reshape(Cout, K)).
    x_nhwc = jnp.transpose(x, (0, 2, 3, 1)).astype(matmul_dtype)          # (N, H, W, Cin)
    xp = jnp.pad(x_nhwc, ((0, 0), (padding, padding), (padding, padding), (0, 0)))
    cols = []
    for i in range(kh):
        for j in range(kw):
            hi, wi = i * dilation, j * dilation
            cols.append(xp[:, hi:hi + (Ho - 1) * stride + 1:stride,
                              wi:wi + (Wo - 1) * stride + 1:stride, :])    # (N, Ho, Wo, Cin)
    patches = jnp.stack(cols, axis=-1).reshape(M, K)                      # contiguous reshape

    # --- lane-/sublane-dense padding & tile clamping ---
    Kp = _round_up(K, 128)
    tk = min(_round_up(block_k, 128), Kp)
    while Kp % tk:
        tk -= 128
    Cp = _round_up(Cout, 128)
    tn = min(_round_up(block_n, 128), Cp)
    while Cp % tn:
        tn -= 128
    block_m = max(8, min(_round_up(block_m, 8), _round_up(M, 8)))
    Mp = _round_up(M, block_m)
    grid_m, grid_n, grid_k = Mp // block_m, Cp // tn, Kp // tk

    patches = jnp.pad(patches, ((0, Mp - M), (0, Kp - K)))
    wmat = jnp.pad(weight.reshape(Cout, K).T.astype(matmul_dtype),
                   ((0, Kp - K), (0, Cp - Cout)))                          # (Kp, Cp)

    vmem_limit = _pick_vmem_limit()
    cparams_reduce = pltpu.CompilerParams(
        dimension_semantics=("arbitrary", "arbitrary", "arbitrary"),
        vmem_limit_bytes=vmem_limit)
    cparams_parallel = pltpu.CompilerParams(
        dimension_semantics=("parallel",),
        vmem_limit_bytes=vmem_limit)

    # --- Pass 1: tiled matmul + streaming per-channel sum / sumsq ---
    y_pad, ch_sum, ch_ssq = pl.pallas_call(
        _conv_stats_kernel,
        grid=(grid_n, grid_m, grid_k),
        in_specs=[
            pl.BlockSpec((block_m, tk), lambda n, m, k: (m, k)),   # patch tiles
            pl.BlockSpec((tk, tn), lambda n, m, k: (k, n)),        # weight tiles
        ],
        out_specs=[
            pl.BlockSpec((block_m, tn), lambda n, m, k: (m, n)),   # conv output tiles
            pl.BlockSpec((1, tn), lambda n, m, k: (0, n)),         # per-channel sum
            pl.BlockSpec((1, tn), lambda n, m, k: (0, n)),         # per-channel sumsq
        ],
        out_shape=[
            jax.ShapeDtypeStruct((Mp, Cp), y_dtype),
            jax.ShapeDtypeStruct((1, Cp), jnp.float32),
            jax.ShapeDtypeStruct((1, Cp), jnp.float32),
        ],
        scratch_shapes=[
            pltpu.VMEM((block_m, tn), jnp.float32),   # f32 K accumulator
            pltpu.VMEM((8, tn), jnp.float32),         # sublane-folded sum
            pltpu.VMEM((8, tn), jnp.float32),         # sublane-folded sumsq
        ],
        compiler_params=cparams_reduce,
    )(patches, wmat)

    # --- tiny per-channel glue: fold BN (batch stats) + affine + MulShift into scale/shift ---
    # Padded rows/channels are zero so they contribute nothing; divide by the true M.
    inv_m = 1.0 / float(M)
    mean = ch_sum * inv_m
    var = jnp.maximum(ch_ssq * inv_m - mean * mean, 0.0)      # biased variance (PyTorch BN)
    inv_std = jax.lax.rsqrt(var + jnp.float32(eps))
    mul = jnp.float32(scale * (2.0 ** (-fl)))
    gamma_p = jnp.pad(gamma.astype(jnp.float32).reshape(1, Cout), ((0, 0), (0, Cp - Cout)))
    beta_p = jnp.pad(beta.astype(jnp.float32).reshape(1, Cout), ((0, 0), (0, Cp - Cout)))
    scale_c = gamma_p * inv_std * mul
    shift_c = (beta_p - mean * gamma_p * inv_std) * mul + jnp.float32(ms_bias * (2.0 ** (-fl)))

    # --- Pass 2: lane-dense normalize + affine + MulShift, large row tiles, megacore-parallel ---
    rows_per_buf = max(1, (8 << 20) // (Cp * 4))              # ~8 MiB per buffered operand
    f = max(1, min(rows_per_buf // block_m, grid_m))
    while grid_m % f:
        f -= 1
    block_m2 = block_m * f
    grid_m2 = Mp // block_m2

    out_pad = pl.pallas_call(
        _bn_apply_kernel,
        grid=(grid_m2,),
        in_specs=[
            pl.BlockSpec((1, Cp), lambda i: (0, 0)),
            pl.BlockSpec((1, Cp), lambda i: (0, 0)),
            pl.BlockSpec((block_m2, Cp), lambda i: (i, 0)),
        ],
        out_specs=pl.BlockSpec((block_m2, Cp), lambda i: (i, 0)),
        out_shape=jax.ShapeDtypeStruct((Mp, Cp), jnp.float32),
        input_output_aliases=({2: 0} if y_dtype == jnp.float32 else {}),
        compiler_params=cparams_parallel,
    )(scale_c, shift_c, y_pad)

    # Slice off M/Cout padding; rows are (n, oh, ow) channel-last.
    out = out_pad[:M, :Cout].reshape(N, Ho, Wo, Cout)
    if nhwc_out:
        return out
    # NOTE: NHWC->NCHW transpose is pure layout plumbing (an extra HBM read+write of the
    # output); callers that can consume NHWC should pass nhwc_out=True to skip it.
    return out.transpose(0, 3, 1, 2)


# ---------------- pure-JAX reference ----------------
def _reference(x, weight, bias, gamma, beta, *, stride, padding, dilation,
               scale, ms_bias, fl, eps):
    y = jax.lax.conv_general_dilated(
        x.astype(jnp.float32), weight.astype(jnp.float32),
        window_strides=(stride, stride), padding=[(padding, padding)] * 2,
        rhs_dilation=(dilation, dilation),
        dimension_numbers=("NCHW", "OIHW", "NCHW"))
    y = y + bias[None, :, None, None]
    mean = y.mean(axis=(0, 2, 3), keepdims=True)
    var = y.var(axis=(0, 2, 3), keepdims=True)       # biased, as in PyTorch BN normalization
    y = (y - mean) / jnp.sqrt(var + eps)
    y = y * gamma[None, :, None, None] + beta[None, :, None, None]
    return (y * scale + ms_bias) * (2.0 ** (-fl))


if __name__ == "__main__":
    key = jax.random.PRNGKey(0)
    k_x, k_w, k_b, k_g, k_be = jax.random.split(key, 5)

    N, Cin, Cout, H, W, ksz = 2, 4, 8, 16, 16, 3
    x = jax.random.normal(k_x, (N, Cin, H, W), dtype=jnp.float32)
    weight = jax.random.normal(k_w, (Cout, Cin, ksz, ksz), dtype=jnp.float32) * 0.1
    bias = jax.random.normal(k_b, (Cout,), dtype=jnp.float32) * 0.1
    gamma = 1.0 + 0.1 * jax.random.normal(k_g, (Cout,), dtype=jnp.float32)
    beta = 0.1 * jax.random.normal(k_be, (Cout,), dtype=jnp.float32)

    # MulShift defaults from the module __init__: scale=1.0, bias=0.0, fl=0.0
    scale, ms_bias, fl, eps = 1.0, 0.0, 0.0, 1e-5

    def run_and_check(tag, stride, padding, dilation, matmul_dtype, atol, rtol):
        out = conv_bn_forward(x, weight, bias, gamma, beta,
                              stride=stride, padding=padding, dilation=dilation,
                              scale=scale, ms_bias=ms_bias, fl=fl, eps=eps,
                              matmul_dtype=matmul_dtype)
        out = jax.block_until_ready(out)
        ref = _reference(x, weight, bias, gamma, beta,
                         stride=stride, padding=padding, dilation=dilation,
                         scale=scale, ms_bias=ms_bias, fl=fl, eps=eps)
        assert out.shape == ref.shape, (tag, out.shape, ref.shape)
        max_err = float(jnp.abs(out - ref).max())
        assert jnp.allclose(out, ref, atol=atol, rtol=rtol), (tag, max_err)

    # Full-precision mode: tight tolerance.
    run_and_check("f32 s1p1", 1, 1, 1, jnp.float32, 2e-4, 2e-4)
    run_and_check("f32 s2p0", 2, 0, 1, jnp.float32, 2e-4, 2e-4)
    # bf16 fast path (default): loose tolerance for bf16 operand/storage rounding.
    run_and_check("bf16 s1p1", 1, 1, 1, jnp.bfloat16, 1e-1, 5e-2)

    print("KERNEL_OK")
</pallas_src>

<mosaic_0001>
module attributes {stable_mosaic.version = 11 : i64} {
  func.func @_conv_stats_kernel(%arg0: i32, %arg1: i32, %arg2: i32, %arg3: memref<512x128xf32, #tpu.memory_space<vmem>>, %arg4: memref<128x128xf32, #tpu.memory_space<vmem>>, %arg5: memref<512x128xf32, #tpu.memory_space<vmem>>, %arg6: memref<1x128xf32, #tpu.memory_space<vmem>>, %arg7: memref<1x128xf32, #tpu.memory_space<vmem>>, %arg8: memref<512x128xf32, #tpu.memory_space<vmem>>, %arg9: memref<8x128xf32, #tpu.memory_space<vmem>>, %arg10: memref<8x128xf32, #tpu.memory_space<vmem>>) attributes {dimension_semantics = [#tpu.dimension_semantics<arbitrary>, #tpu.dimension_semantics<arbitrary>, #tpu.dimension_semantics<arbitrary>], iteration_bounds = array<i64: 1, 1, 1>, scalar_prefetch = 0 : i64, scratch_operands = 3 : i64, tpu.core_type = #tpu.core_type<tc>, window_params = [{transform_indices = @transform_0, window_bounds = array<i64: 512, 128>}, {transform_indices = @transform_1, window_bounds = array<i64: 128, 128>}, {transform_indices = @transform_2, window_bounds = array<i64: 512, 128>}, {transform_indices = @transform_3, window_bounds = array<i64: 1, 128>}, {transform_indices = @transform_4, window_bounds = array<i64: 1, 128>}]} {
    %c0_i32 = arith.constant 0 : i32
    %0 = arith.cmpi eq, %arg2, %c0_i32 : i32
    %1 = arith.extui %0 : i1 to i32
    %c0_i32_0 = arith.constant 0 : i32
    %2 = arith.cmpi ne, %1, %c0_i32_0 : i32
    scf.if %2 {
      %cst_16 = arith.constant 0.000000e+00 : f32
      %22 = vector.broadcast %cst_16 : f32 to vector<512x128xf32>
      %c0_17 = arith.constant 0 : index
      %c0_18 = arith.constant 0 : index
      %23 = vector.load %arg8[%c0_17, %c0_18] : memref<512x128xf32, #tpu.memory_space<vmem>>, vector<512x128xf32>
      tpu.vector_store %arg8[%c0_17, %c0_18], %22 {strides = array<i32>} : memref<512x128xf32, #tpu.memory_space<vmem>>, vector<512x128xf32>,
    } else {
    }
    %c0_i32_1 = arith.constant 0 : i32
    %3 = arith.cmpi eq, %arg1, %c0_i32_1 : i32
    %c0_i32_2 = arith.constant 0 : i32
    %4 = arith.cmpi eq, %arg2, %c0_i32_2 : i32
    %5 = arith.andi %3, %4 : i1
    %6 = arith.extui %5 : i1 to i32
    %c0_i32_3 = arith.constant 0 : i32
    %7 = arith.cmpi ne, %6, %c0_i32_3 : i32
    scf.if %7 {
      %cst_16 = arith.constant 0.000000e+00 : f32
      %22 = vector.broadcast %cst_16 : f32 to vector<8x128xf32>
      %c0_17 = arith.constant 0 : index
      %c0_18 = arith.constant 0 : index
      %23 = vector.load %arg9[%c0_17, %c0_18] : memref<8x128xf32, #tpu.memory_space<vmem>>, vector<8x128xf32>
      tpu.vector_store %arg9[%c0_17, %c0_18], %22 {strides = array<i32>} : memref<8x128xf32, #tpu.memory_space<vmem>>, vector<8x128xf32>,
      %cst_19 = arith.constant 0.000000e+00 : f32
      %24 = vector.broadcast %cst_19 : f32 to vector<8x128xf32>
      %c0_20 = arith.constant 0 : index
      %c0_21 = arith.constant 0 : index
      %25 = vector.load %arg10[%c0_20, %c0_21] : memref<8x128xf32, #tpu.memory_space<vmem>>, vector<8x128xf32>
      tpu.vector_store %arg10[%c0_20, %c0_21], %24 {strides = array<i32>} : memref<8x128xf32, #tpu.memory_space<vmem>>, vector<8x128xf32>,
    } else {
    }
    %c0 = arith.constant 0 : index
    %c0_4 = arith.constant 0 : index
    %8 = vector.load %arg8[%c0, %c0_4] : memref<512x128xf32, #tpu.memory_space<vmem>>, vector<512x128xf32>
    %c0_5 = arith.constant 0 : index
    %c0_6 = arith.constant 0 : index
    %9 = vector.load %arg3[%c0_5, %c0_6] : memref<512x128xf32, #tpu.memory_space<vmem>>, vector<512x128xf32>
    %c0_7 = arith.constant 0 : index
    %c0_8 = arith.constant 0 : index
    %10 = vector.load %arg4[%c0_7, %c0_8] : memref<128x128xf32, #tpu.memory_space<vmem>>, vector<128x128xf32>
    %cst = arith.constant dense<0.000000e+00> : vector<512x128xf32>
    %11 = tpu.matmul %9, %10, %cst {dimension_numbers = #tpu.dot_dimension_numbers<[1], [0], [0], [1], [0, 0, 1, 1], [], []>} : vector<512x128xf32>, vector<128x128xf32>, vector<512x128xf32> -> vector<512x128xf32>
    %12 = arith.addf %8, %11 : vector<512x128xf32>
    %c0_9 = arith.constant 0 : index
    %c0_10 = arith.constant 0 : index
    %13 = vector.load %arg8[%c0_9, %c0_10] : memref<512x128xf32, #tpu.memory_space<vmem>>, vector<512x128xf32>
    tpu.vector_store %arg8[%c0_9, %c0_10], %12 {strides = array<i32>} : memref<512x128xf32, #tpu.memory_space<vmem>>, vector<512x128xf32>,
    %c0_i32_11 = arith.constant 0 : i32
    %14 = arith.cmpi eq, %arg2, %c0_i32_11 : i32
    %15 = arith.extui %14 : i1 to i32
    %c0_i32_12 = arith.constant 0 : i32
    %16 = arith.cmpi ne, %15, %c0_i32_12 : i32
    scf.if %16 {
      %c0_16 = arith.constant 0 : index
      %c0_17 = arith.constant 0 : index
      %22 = vector.load %arg8[%c0_16, %c0_17] : memref<512x128xf32, #tpu.memory_space<vmem>>, vector<512x128xf32>
      %c0_18 = arith.constant 0 : index
      %c0_19 = arith.constant 0 : index
      %23 = vector.load %arg5[%c0_18, %c0_19] : memref<512x128xf32, #tpu.memory_space<vmem>>, vector<512x128xf32>
      tpu.vector_store %arg5[%c0_18, %c0_19], %22 {strides = array<i32>} : memref<512x128xf32, #tpu.memory_space<vmem>>, vector<512x128xf32>,
      %24 = vector.shape_cast %22 : vector<512x128xf32> to vector<64x8x128xf32>
      %c0_20 = arith.constant 0 : index
      %c0_21 = arith.constant 0 : index
      %25 = vector.load %arg9[%c0_20, %c0_21] : memref<8x128xf32, #tpu.memory_space<vmem>>, vector<8x128xf32>
      %cst_22 = arith.constant dense<0.000000e+00> : vector<8x128xf32>
      %26 = vector.multi_reduction <add>, %24, %cst_22 [0] : vector<64x8x128xf32> to vector<8x128xf32>
      %27 = arith.addf %25, %26 : vector<8x128xf32>
      %c0_23 = arith.constant 0 : index
      %c0_24 = arith.constant 0 : index
      %28 = vector.load %arg9[%c0_23, %c0_24] : memref<8x128xf32, #tpu.memory_space<vmem>>, vector<8x128xf32>
      tpu.vector_store %arg9[%c0_23, %c0_24], %27 {strides = array<i32>} : memref<8x128xf32, #tpu.memory_space<vmem>>, vector<8x128xf32>,
      %c0_25 = arith.constant 0 : index
      %c0_26 = arith.constant 0 : index
      %29 = vector.load %arg10[%c0_25, %c0_26] : memref<8x128xf32, #tpu.memory_space<vmem>>, vector<8x128xf32>
      %30 = arith.mulf %24, %24 : vector<64x8x128xf32>
      %cst_27 = arith.constant dense<0.000000e+00> : vector<8x128xf32>
      %31 = vector.multi_reduction <add>, %30, %cst_27 [0] : vector<64x8x128xf32> to vector<8x128xf32>
      %32 = arith.addf %29, %31 : vector<8x128xf32>
      %c0_28 = arith.constant 0 : index
      %c0_29 = arith.constant 0 : index
      %33 = vector.load %arg10[%c0_28, %c0_29] : memref<8x128xf32, #tpu.memory_space<vmem>>, vector<8x128xf32>
      tpu.vector_store %arg10[%c0_28, %c0_29], %32 {strides = array<i32>} : memref<8x128xf32, #tpu.memory_space<vmem>>, vector<8x128xf32>,
    } else {
    }
    %c0_i32_13 = arith.constant 0 : i32
    %17 = arith.cmpi eq, %arg1, %c0_i32_13 : i32
    %c0_i32_14 = arith.constant 0 : i32
    %18 = arith.cmpi eq, %arg2, %c0_i32_14 : i32
    %19 = arith.andi %17, %18 : i1
    %20 = arith.extui %19 : i1 to i32
    %c0_i32_15 = arith.constant 0 : i32
    %21 = arith.cmpi ne, %20, %c0_i32_15 : i32
    scf.if %21 {
      %c0_16 = arith.constant 0 : index
      %c0_17 = arith.constant 0 : index
      %22 = vector.load %arg9[%c0_16, %c0_17] : memref<8x128xf32, #tpu.memory_space<vmem>>, vector<8x128xf32>
      %cst_18 = arith.constant dense<0.000000e+00> : vector<128xf32>
      %23 = vector.multi_reduction <add>, %22, %cst_18 [0] : vector<8x128xf32> to vector<128xf32>
      %24 = vector.shape_cast %23 : vector<128xf32> to vector<1x128xf32>
      %c0_19 = arith.constant 0 : index
      %c0_20 = arith.constant 0 : index
      %25 = vector.load %arg6[%c0_19, %c0_20] : memref<1x128xf32, #tpu.memory_space<vmem>>, vector<1x128xf32>
      tpu.vector_store %arg6[%c0_19, %c0_20], %24 {strides = array<i32>} : memref<1x128xf32, #tpu.memory_space<vmem>>, vector<1x128xf32>,
      %c0_21 = arith.constant 0 : index
      %c0_22 = arith.constant 0 : index
      %26 = vector.load %arg10[%c0_21, %c0_22] : memref<8x128xf32, #tpu.memory_space<vmem>>, vector<8x128xf32>
      %cst_23 = arith.constant dense<0.000000e+00> : vector<128xf32>
      %27 = vector.multi_reduction <add>, %26, %cst_23 [0] : vector<8x128xf32> to vector<128xf32>
      %28 = vector.shape_cast %27 : vector<128xf32> to vector<1x128xf32>
      %c0_24 = arith.constant 0 : index
      %c0_25 = arith.constant 0 : index
      %29 = vector.load %arg7[%c0_24, %c0_25] : memref<1x128xf32, #tpu.memory_space<vmem>>, vector<1x128xf32>
      tpu.vector_store %arg7[%c0_24, %c0_25], %28 {strides = array<i32>} : memref<1x128xf32, #tpu.memory_space<vmem>>, vector<1x128xf32>,
    } else {
    }
    return
  }
  func.func @transform_0(%arg0: i32, %arg1: i32, %arg2: i32) -> (i32, i32) {
    %c0_i32 = arith.constant 0 : i32
    return %arg1, %arg2 : i32, i32
  }
  func.func @transform_1(%arg0: i32, %arg1: i32, %arg2: i32) -> (i32, i32) {
    %c0_i32 = arith.constant 0 : i32
    return %arg2, %arg0 : i32, i32
  }
  func.func @transform_2(%arg0: i32, %arg1: i32, %arg2: i32) -> (i32, i32) {
    %c0_i32 = arith.constant 0 : i32
    return %arg1, %arg0 : i32, i32
  }
  func.func @transform_3(%arg0: i32, %arg1: i32, %arg2: i32) -> (i32, i32) {
    %c0_i32 = arith.constant 0 : i32
    %c0_i32_0 = arith.constant 0 : i32
    return %c0_i32, %arg0 : i32, i32
  }
  func.func @transform_4(%arg0: i32, %arg1: i32, %arg2: i32) -> (i32, i32) {
    %c0_i32 = arith.constant 0 : i32
    %c0_i32_0 = arith.constant 0 : i32
    return %c0_i32, %arg0 : i32, i32
  }
}

</mosaic_0001>

<bundles_post_ra>
// kernel: tpu_custom_call.1
= control target key start
LH: loop header
LB: loop body
LE: loop exit
PB: predicated region body
PF: predicated region fallthrough
CT: control target
= control target key end

     0   :  { %10 = vsyncpa [#allocation6], 0  ;;  %s1527_s0 = inlined_call_operand.hbm [shape: f32[512,128], index: 0, kind: input, shape index: {}]   ;;  %s1528_s1 = inlined_call_operand.hbm [shape: f32[128,128], index: 1, kind: input, shape index: {}]   ;;  %s1529_s2 = inlined_call_operand.hbm [shape: f32[512,128], index: 2, kind: output, shape index: {0}]   ;;  %s1530_s3 = inlined_call_operand.hbm [shape: f32[1,128], index: 3, kind: output, shape index: {1}]   ;;  %s1531_s4 = inlined_call_operand.hbm [shape: f32[1,128], index: 4, kind: output, shape index: {2}]  }
   0x1   :  { %11 = vsyncpa [#allocation9], 0 }
   0x2   :  { %12 = vsyncpa [#allocation7], 0 }
   0x3   :  { %13 = vsyncpa [#allocation12], 0  ;;  %s18_s17 = sshll.u32 %s1527_s0, 4  ;;  %s1183_s18 = smov [#allocation5]   ;;  %s19_s17 = int_to_ptr.hbm [resolvable:$true] %s18_s17 }
   0x4   :  { %s20_s19 = sshll.u32 %s1183_s18, 4  ;;  %s31_s22 = sshll.u32 %s1528_s1, 4  ;;  %s21_s19 = int_to_ptr.vmem [resolvable:$true] %s20_s19  ;;  %s32_s22 = int_to_ptr.hbm [resolvable:$true] %s31_s22 }
   0x5   :  { %s1184_s23 = smov 128   ;;  %s1185_s24 = smov 8  }
   0x6   :  { %26 = dma.hbm_to_vmem [thread:$0]  %s19_s17, 8192, %s21_s19, [#allocation6], %s1184_s23, %s1184_s23, %s1185_s24  }
   0x7   :  { %s1186_s25 = smov [#allocation8]  }
   0x8   :  { %s33_s26 = sshll.u32 %s1186_s25, 4  ;;  %s34_s26 = int_to_ptr.vmem [resolvable:$true] %s33_s26 }
   0x9   :  { %39 = dma.hbm_to_vmem [thread:$0]  %s32_s22, 2048, %s34_s26, [#allocation9], %s1184_s23, %s1184_s23, %s1185_s24  }
   0xa   :  { %1175 = dma.done.wait [#allocation6], 8192  }
   0xb   :  { %1176 = vsyncadd [#allocation6], 4294959104 }
   0xc   :  { %1177 = dma.done.wait [#allocation9], 2048  }
   0xd   :  { %1178 = vsyncadd [#allocation9], 4294965248  ;;  %v266_v0 = vld [vmem:[#allocation8 + $0x78] sm:$0xff]  ;;  %v265_v1 = vld [vmem:[#allocation8 + $0x70] sm:$0xff]  ;;  %s1187_s0 = smov [#allocation10]   ;;  %s955_s29 = sshll.u32 %s1529_s2, 4  ;;  %s956_s29 = int_to_ptr.hbm [resolvable:$true] %s955_s29 }
   0xe   :  { %267 = vmatpush.msra.mxu0 %v266_v0  ;;  %1000 = vmatpush.msra.mxu1 %v266_v0  ;;  %v264_v2 = vld [vmem:[#allocation8 + $0x68] sm:$0xff]  ;;  %v263_v3 = vld [vmem:[#allocation8 + $0x60] sm:$0xff]  ;;  %v262_v4 = vld [vmem:[#allocation8 + $0x58] sm:$0xff]  ;;  %s953_s1 = sshll.u32 %s1187_s0, 4  ;;  %s1188_s2 = smov [#allocation11]   ;;  %s954_s1 = int_to_ptr.vmem [resolvable:$true] %s953_s1 }
   0xf   :  { %1001 = vmatpush.msra.mxu2 %v266_v0  ;;  %1002 = vmatpush.msra.mxu3 %v266_v0  ;;  %v261_v5 = vld [vmem:[#allocation8 + $0x50] sm:$0xff]  ;;  %v260_v6 = vld [vmem:[#allocation8 + $0x48] sm:$0xff]  ;;  %v259_v7 = vld [vmem:[#allocation8 + $0x40] sm:$0xff]  ;;  %s967_s30 = sshll.u32 %s1188_s2, 4  ;;  %s969_s7 = sshll.u32 %s1530_s3, 4  ;;  %s968_s30 = int_to_ptr.vmem [resolvable:$true] %s967_s30  ;;  %s970_s7 = int_to_ptr.hbm [resolvable:$true] %s969_s7 }
  0x10   :  { %268 = vmatpush.msra.mxu0 %v265_v1  ;;  %1003 = vmatpush.msra.mxu1 %v265_v1  ;;  %v258_v8 = vld [vmem:[#allocation8 + $0x38] sm:$0xff]  ;;  %v257_v9 = vld [vmem:[#allocation8 + $0x30] sm:$0xff]  ;;  %v256_v10 = vld [vmem:[#allocation8 + $0x28] sm:$0xff]  ;;  %s1189_s8 = smov [#allocation13]   ;;  %s980_s12 = sshll.u32 %s1531_s4, 4  ;;  %s981_s12 = int_to_ptr.hbm [resolvable:$true] %s980_s12 }
  0x11   :  { %1004 = vmatpush.msra.mxu2 %v265_v1  ;;  %1005 = vmatpush.msra.mxu3 %v265_v1  ;;  %v255_v11 = vld [vmem:[#allocation8 + $0x20] sm:$0xff]  ;;  %v254_v12 = vld [vmem:[#allocation8 + $0x18] sm:$0xff]  ;;  %v253_v13 = vld [vmem:[#allocation8 + $0x10] sm:$0xff]  ;;  %s978_s9 = sshll.u32 %s1189_s8, 4  ;;  %s979_s9 = int_to_ptr.vmem [resolvable:$true] %s978_s9 }
  0x12   :  { %269 = vmatpush.msra.mxu0 %v264_v2  ;;  %1006 = vmatpush.msra.mxu1 %v264_v2  ;;  %v252_v14 = vld [vmem:[#allocation8 + $0x8] sm:$0xff]  ;;  %v251_v15 = vld [vmem:[#allocation8] sm:$0xff]  ;;  %v189_v20 = vld [vmem:[#allocation5 + $0x10] sm:$0xff] }
  0x13   :  { %1007 = vmatpush.msra.mxu2 %v264_v2  ;;  %1008 = vmatpush.msra.mxu3 %v264_v2  ;;  %v187_v16 = vld [vmem:[#allocation5] sm:$0xff]  ;;  %v188_v18 = vld [vmem:[#allocation5 + $0x8] sm:$0xff]  ;;  %v205_v21 = vld [vmem:[#allocation5 + $0x90] sm:$0xff] }
  0x14   :  { %270 = vmatpush.msra.mxu0 %v263_v3  ;;  %1009 = vmatpush.msra.mxu1 %v263_v3  ;;  %v203_v17 = vld [vmem:[#allocation5 + $0x80] sm:$0xff]  ;;  %v204_v19 = vld [vmem:[#allocation5 + $0x88] sm:$0xff]  ;;  %v190_v22 = vld [vmem:[#allocation5 + $0x18] sm:$0xff] }
  0x15   :  { %1010 = vmatpush.msra.mxu2 %v263_v3  ;;  %1011 = vmatpush.msra.mxu3 %v263_v3  ;;  %v206_v23 = vld [vmem:[#allocation5 + $0x98] sm:$0xff]  ;;  %v219_v24 = vld [vmem:[#allocation5 + $0x100] sm:$0xff]  ;;  %v220_v27 = vld [vmem:[#allocation5 + $0x108] sm:$0xff] }
  0x16   :  { %271 = vmatpush.msra.mxu0 %v262_v4  ;;  %1012 = vmatpush.msra.mxu1 %v262_v4  ;;  %v191_v25 = vld [vmem:[#allocation5 + $0x20] sm:$0xff]  ;;  %v192_v28 = vld [vmem:[#allocation5 + $0x28] sm:$0xff]  ;;  %v221_v30 = vld [vmem:[#allocation5 + $0x110] sm:$0xff] }
  0x17   :  { %1013 = vmatpush.msra.mxu2 %v262_v4  ;;  %1014 = vmatpush.msra.mxu3 %v262_v4  ;;  %v207_v26 = vld [vmem:[#allocation5 + $0xa0] sm:$0xff]  ;;  %v208_v29 = vld [vmem:[#allocation5 + $0xa8] sm:$0xff]  ;;  %v193_v31 = vld [vmem:[#allocation5 + $0x30] sm:$0xff] }
  0x18   :  { %272 = vmatpush.msra.mxu0 %v261_v5  ;;  %1015 = vmatpush.msra.mxu1 %v261_v5  ;;  %v209_v32 = vld [vmem:[#allocation5 + $0xb0] sm:$0xff]  ;;  %v222_v33 = vld [vmem:[#allocation5 + $0x118] sm:$0xff]  ;;  %v223_v36 = vld [vmem:[#allocation5 + $0x120] sm:$0xff] }
  0x19   :  { %1016 = vmatpush.msra.mxu2 %v261_v5  ;;  %1017 = vmatpush.msra.mxu3 %v261_v5  ;;  %v194_v34 = vld [vmem:[#allocation5 + $0x38] sm:$0xff]  ;;  %v235_v37 = vld [vmem:[#allocation5 + $0x180] sm:$0xff]  ;;  %v224_v40 = vld [vmem:[#allocation5 + $0x128] sm:$0xff] }
  0x1a   :  { %273 = vmatpush.msra.mxu0 %v260_v6  ;;  %1018 = vmatpush.msra.mxu1 %v260_v6  ;;  %v210_v35 = vld [vmem:[#allocation5 + $0xb8] sm:$0xff]  ;;  %v195_v38 = vld [vmem:[#allocation5 + $0x40] sm:$0xff]  ;;  %v236_v41 = vld [vmem:[#allocation5 + $0x188] sm:$0xff] }
  0x1b   :  { %1019 = vmatpush.msra.mxu2 %v260_v6  ;;  %1020 = vmatpush.msra.mxu3 %v260_v6  ;;  %v211_v39 = vld [vmem:[#allocation5 + $0xc0] sm:$0xff]  ;;  %v196_v42 = vld [vmem:[#allocation5 + $0x48] sm:$0xff]  ;;  %v225_v44 = vld [vmem:[#allocation5 + $0x130] sm:$0xff] }
  0x1c   :  { %274 = vmatpush.msra.mxu0 %v259_v7  ;;  %1021 = vmatpush.msra.mxu1 %v259_v7  ;;  %v212_v43 = vld [vmem:[#allocation5 + $0xc8] sm:$0xff]  ;;  %v237_v45 = vld [vmem:[#allocation5 + $0x190] sm:$0xff]  ;;  %v226_v48 = vld [vmem:[#allocation5 + $0x138] sm:$0xff] }
  0x1d   :  { %1022 = vmatpush.msra.mxu2 %v259_v7  ;;  %1023 = vmatpush.msra.mxu3 %v259_v7  ;;  %v197_v46 = vld [vmem:[#allocation5 + $0x50] sm:$0xff]  ;;  %v238_v49 = vld [vmem:[#allocation5 + $0x198] sm:$0xff]  ;;  %v227_v52 = vld [vmem:[#allocation5 + $0x140] sm:$0xff] }
  0x1e   :  { %275 = vmatpush.msra.mxu0 %v258_v8  ;;  %1024 = vmatpush.msra.mxu1 %v258_v8  ;;  %v213_v47 = vld [vmem:[#allocation5 + $0xd0] sm:$0xff]  ;;  %v198_v50 = vld [vmem:[#allocation5 + $0x58] sm:$0xff]  ;;  %v239_v53 = vld [vmem:[#allocation5 + $0x1a0] sm:$0xff] }
  0x1f   :  { %1025 = vmatpush.msra.mxu2 %v258_v8  ;;  %1026 = vmatpush.msra.mxu3 %v258_v8  ;;  %v214_v51 = vld [vmem:[#allocation5 + $0xd8] sm:$0xff]  ;;  %v199_v54 = vld [vmem:[#allocation5 + $0x60] sm:$0xff]  ;;  %v228_v56 = vld [vmem:[#allocation5 + $0x148] sm:$0xff] }
  0x20   :  { %276 = vmatpush.msra.mxu0 %v257_v9  ;;  %1027 = vmatpush.msra.mxu1 %v257_v9  ;;  %v215_v55 = vld [vmem:[#allocation5 + $0xe0] sm:$0xff]  ;;  %v240_v57 = vld [vmem:[#allocation5 + $0x1a8] sm:$0xff]  ;;  %v229_v60 = vld [vmem:[#allocation5 + $0x150] sm:$0xff] }
  0x21   :  { %1028 = vmatpush.msra.mxu2 %v257_v9  ;;  %1029 = vmatpush.msra.mxu3 %v257_v9  ;;  %v200_v58 = vld [vmem:[#allocation5 + $0x68] sm:$0xff]  ;;  %v241_v61 = vld [vmem:[#allocation5 + $0x1b0] sm:$0xff]  ;;  %v230_v0 = vld [vmem:[#allocation5 + $0x158] sm:$0xff] }
  0x22   :  { %277 = vmatpush.msra.mxu0 %v256_v10  ;;  %1030 = vmatpush.msra.mxu1 %v256_v10  ;;  %v216_v59 = vld [vmem:[#allocation5 + $0xe8] sm:$0xff]  ;;  %v201_v62 = vld [vmem:[#allocation5 + $0x70] sm:$0xff]  ;;  %v242_v1 = vld [vmem:[#allocation5 + $0x1b8] sm:$0xff] }
  0x23   :  { %1031 = vmatpush.msra.mxu2 %v256_v10  ;;  %1032 = vmatpush.msra.mxu3 %v256_v10  ;;  %v217_v63 = vld [vmem:[#allocation5 + $0xf0] sm:$0xff]  ;;  %v202_v2 = vld [vmem:[#allocation5 + $0x78] sm:$0xff]  ;;  %v231_v4 = vld [vmem:[#allocation5 + $0x160] sm:$0xff] }
  0x24   :  { %278 = vmatpush.msra.mxu0 %v255_v11  ;;  %1033 = vmatpush.msra.mxu1 %v255_v11  ;;  %v218_v3 = vld [vmem:[#allocation5 + $0xf8] sm:$0xff]  ;;  %v243_v5 = vld [vmem:[#allocation5 + $0x1c0] sm:$0xff]  ;;  %v232_v8 = vld [vmem:[#allocation5 + $0x168] sm:$0xff] }
  0x25   :  { %1034 = vmatpush.msra.mxu2 %v255_v11  ;;  %1035 = vmatpush.msra.mxu3 %v255_v11  ;;  %v244_v9 = vld [vmem:[#allocation5 + $0x1c8] sm:$0xff] }
  0x26   :  { %279 = vmatpush.msra.mxu0 %v254_v12  ;;  %1036 = vmatpush.msra.mxu1 %v254_v12 }
  0x27   :  { %1037 = vmatpush.msra.mxu2 %v254_v12  ;;  %1038 = vmatpush.msra.mxu3 %v254_v12 }
  0x28   :  { %280 = vmatpush.msra.mxu0 %v253_v13  ;;  %1039 = vmatpush.msra.mxu1 %v253_v13 }
  0x29   :  { %1040 = vmatpush.msra.mxu2 %v253_v13  ;;  %1041 = vmatpush.msra.mxu3 %v253_v13 }
  0x2a   :  { %281 = vmatpush.msra.mxu0 %v252_v14  ;;  %1042 = vmatpush.msra.mxu1 %v252_v14 }
  0x2b   :  { %1043 = vmatpush.msra.mxu2 %v252_v14  ;;  %1044 = vmatpush.msra.mxu3 %v252_v14 }
  0x2c   :  { %282 = vmatpush.msra.mxu0 %v251_v15  ;;  %1045 = vmatpush.msra.mxu1 %v251_v15 }
  0x2d   :  { %283 = vmatmul.f32.vlgmr.msra.gmra.mxu0 %v187_v16  ;;  %331 = vmatmul.f32.vlgmr.msra.gmra.mxu1 %v203_v17  ;;  %v233_v16 = vld [vmem:[#allocation5 + $0x170] sm:$0xff] }
  0x2e   :  { %1046 = vmatpush.msra.mxu2 %v251_v15  ;;  %1047 = vmatpush.msra.mxu3 %v251_v15  ;;  %v245_v17 = vld [vmem:[#allocation5 + $0x1d0] sm:$0xff] }
  0x2f   :  { %379 = vmatmul.f32.vlgmr.msra.gmra.mxu2 %v219_v24  ;;  %427 = vmatmul.f32.vlgmr.msra.gmra.mxu3 %v235_v37  ;;  %v246_v24 = vld [vmem:[#allocation5 + $0x1d8] sm:$0xff]  ;;  %v248_v37 = vld [vmem:[#allocation5 + $0x1e8] sm:$0xff] }
  0x35   :  { %286 = vmatmul.f32.gmra.mxu0 %v188_v18  ;;  %334 = vmatmul.f32.gmra.mxu1 %v204_v19 }
  0x37   :  { %382 = vmatmul.f32.gmra.mxu2 %v220_v27  ;;  %430 = vmatmul.f32.gmra.mxu3 %v236_v41  ;;  %v249_v41 = vld [vmem:[#allocation5 + $0x1f0] sm:$0xff] }
  0x3d   :  { %289 = vmatmul.f32.gmra.mxu0 %v189_v20  ;;  %337 = vmatmul.f32.gmra.mxu1 %v205_v21 }
  0x3f   :  { %385 = vmatmul.f32.gmra.mxu2 %v221_v30  ;;  %433 = vmatmul.f32.gmra.mxu3 %v237_v45  ;;  %v247_v30 = vld [vmem:[#allocation5 + $0x1e0] sm:$0xff]  ;;  %v250_v45 = vld [vmem:[#allocation5 + $0x1f8] sm:$0xff] }
  0x45   :  { %292 = vmatmul.f32.gmra.mxu0 %v190_v22  ;;  %340 = vmatmul.f32.gmra.mxu1 %v206_v23  ;;  %v234_v23 = vld [vmem:[#allocation5 + $0x178] sm:$0xff] }
  0x47   :  { %388 = vmatmul.f32.gmra.mxu2 %v222_v33  ;;  %436 = vmatmul.f32.gmra.mxu3 %v238_v49 }
  0x4d   :  { %295 = vmatmul.f32.gmra.mxu0 %v191_v25  ;;  %343 = vmatmul.f32.gmra.mxu1 %v207_v26 }
  0x4f   :  { %391 = vmatmul.f32.gmra.mxu2 %v223_v36  ;;  %439 = vmatmul.f32.gmra.mxu3 %v239_v53 }
  0x55   :  { %298 = vmatmul.f32.gmra.mxu0 %v192_v28  ;;  %346 = vmatmul.f32.gmra.mxu1 %v208_v29 }
  0x57   :  { %394 = vmatmul.f32.gmra.mxu2 %v224_v40  ;;  %442 = vmatmul.f32.gmra.mxu3 %v240_v57 }
  0x5d   :  { %301 = vmatmul.f32.gmra.mxu0 %v193_v31  ;;  %349 = vmatmul.f32.gmra.mxu1 %v209_v32 }
  0x5f   :  { %397 = vmatmul.f32.gmra.mxu2 %v225_v44  ;;  %445 = vmatmul.f32.gmra.mxu3 %v241_v61 }
  0x65   :  { %304 = vmatmul.f32.gmra.mxu0 %v194_v34  ;;  %352 = vmatmul.f32.gmra.mxu1 %v210_v35 }
  0x67   :  { %400 = vmatmul.f32.gmra.mxu2 %v226_v48  ;;  %448 = vmatmul.f32.gmra.mxu3 %v242_v1 }
  0x6d   :  { %307 = vmatmul.f32.gmra.mxu0 %v195_v38  ;;  %355 = vmatmul.f32.gmra.mxu1 %v211_v39 }
  0x6f   :  { %403 = vmatmul.f32.gmra.mxu2 %v227_v52  ;;  %451 = vmatmul.f32.gmra.mxu3 %v243_v5 }
  0x75   :  { %310 = vmatmul.f32.gmra.mxu0 %v196_v42  ;;  %358 = vmatmul.f32.gmra.mxu1 %v212_v43 }
  0x77   :  { %406 = vmatmul.f32.gmra.mxu2 %v228_v56  ;;  %454 = vmatmul.f32.gmra.mxu3 %v244_v9 }
  0x7d   :  { %313 = vmatmul.f32.gmra.mxu0 %v197_v46  ;;  %361 = vmatmul.f32.gmra.mxu1 %v213_v47 }
  0x7f   :  { %409 = vmatmul.f32.gmra.mxu2 %v229_v60  ;;  %457 = vmatmul.f32.gmra.mxu3 %v245_v17 }
  0x85   :  { %316 = vmatmul.f32.gmra.mxu0 %v198_v50  ;;  %364 = vmatmul.f32.gmra.mxu1 %v214_v51 }
  0x87   :  { %412 = vmatmul.f32.gmra.mxu2 %v230_v0  ;;  %460 = vmatmul.f32.gmra.mxu3 %v246_v24 }
  0x8d   :  { %319 = vmatmul.f32.gmra.mxu0 %v199_v54  ;;  %367 = vmatmul.f32.gmra.mxu1 %v215_v55 }
  0x8f   :  { %415 = vmatmul.f32.gmra.mxu2 %v231_v4  ;;  %463 = vmatmul.f32.gmra.mxu3 %v247_v30 }
  0x95   :  { %322 = vmatmul.f32.gmra.mxu0 %v200_v58  ;;  %370 = vmatmul.f32.gmra.mxu1 %v216_v59 }
  0x97   :  { %418 = vmatmul.f32.gmra.mxu2 %v232_v8  ;;  %466 = vmatmul.f32.gmra.mxu3 %v248_v37 }
  0x9d   :  { %325 = vmatmul.f32.gmra.mxu0 %v201_v62  ;;  %373 = vmatmul.f32.gmra.mxu1 %v217_v63 }
  0x9f   :  { %421 = vmatmul.f32.gmra.mxu2 %v233_v16  ;;  %469 = vmatmul.f32.gmra.mxu3 %v249_v41 }
  0xa5   :  { %328 = vmatmul.f32.gmra.mxu0 %v202_v2  ;;  %376 = vmatmul.f32.gmra.mxu1 %v218_v3 }
  0xa7   :  { %424 = vmatmul.f32.gmra.mxu2 %v234_v23  ;;  %472 = vmatmul.f32.gmra.mxu3 %v250_v45 }
  0xaa   :  { %v284_v6 = vpop.f32.mrf.mxu0  ;;  %v1227_v7 = vpop.f32.mrf.mxu1 }
  0xab   :  { %671 = vst [vmem:[#allocation10] sm:$0xff] %v284_v6  ;;  %v802_v12 = vmul.f32 %v284_v6, %v284_v6 }
  0xac   :  { %687 = vst [vmem:[#allocation10 + $0x80] sm:$0xff] %v1227_v7 }
  0xb2   :  { %v287_v10 = vpop.f32.mrf.mxu0  ;;  %v1230_v11 = vpop.f32.mrf.mxu1 }
  0xb3   :  { %672 = vst [vmem:[#allocation10 + $0x8] sm:$0xff] %v287_v10  ;;  %v736_v13 = vadd.f32 %v287_v10, %v284_v6  ;;  %v803_v14 = vmul.f32 %v287_v10, %v287_v10  ;;  %v1243_v35 = vpop.f32.mrf.mxu2  ;;  %v1274_v52 = vpop.f32.mrf.mxu3 }
  0xb4   :  { %688 = vst [vmem:[#allocation10 + $0x88] sm:$0xff] %v1230_v11 }
  0xb5   :  { %v866_v15 = vadd.f32 %v803_v14, %v802_v12  ;;  %703 = vst [vmem:[#allocation10 + $0x100] sm:$0xff] %v1243_v35 }
  0xb6   :  { %719 = vst [vmem:[#allocation10 + $0x180] sm:$0xff] %v1274_v52 }
  0xba   :  { %v290_v18 = vpop.f32.mrf.mxu0  ;;  %v1233_v19 = vpop.f32.mrf.mxu1 }
  0xbb   :  { %673 = vst [vmem:[#allocation10 + $0x10] sm:$0xff] %v290_v18  ;;  %v737_v20 = vadd.f32 %v736_v13, %v290_v18  ;;  %v804_v21 = vmul.f32 %v290_v18, %v290_v18  ;;  %v1254_v40 = vpop.f32.mrf.mxu2  ;;  %v1283_v56 = vpop.f32.mrf.mxu3 }
  0xbc   :  { %689 = vst [vmem:[#allocation10 + $0x90] sm:$0xff] %v1233_v19 }
  0xbd   :  { %v867_v22 = vadd.f32 %v866_v15, %v804_v21  ;;  %704 = vst [vmem:[#allocation10 + $0x108] sm:$0xff] %v1254_v40 }
  0xbe   :  { %720 = vst [vmem:[#allocation10 + $0x188] sm:$0xff] %v1283_v56 }
  0xc2   :  { %v293_v25 = vpop.f32.mrf.mxu0  ;;  %v1236_v26 = vpop.f32.mrf.mxu1 }
  0xc3   :  { %674 = vst [vmem:[#allocation10 + $0x18] sm:$0xff] %v293_v25  ;;  %v738_v27 = vadd.f32 %v737_v20, %v293_v25  ;;  %v805_v28 = vmul.f32 %v293_v25, %v293_v25  ;;  %v1260_v44 = vpop.f32.mrf.mxu2  ;;  %v1292_v60 = vpop.f32.mrf.mxu3 }
  0xc4   :  { %690 = vst [vmem:[#allocation10 + $0x98] sm:$0xff] %v1236_v26 }
  0xc5   :  { %v868_v29 = vadd.f32 %v867_v22, %v805_v28  ;;  %705 = vst [vmem:[#allocation10 + $0x110] sm:$0xff] %v1260_v44 }
  0xc6   :  { %721 = vst [vmem:[#allocation10 + $0x190] sm:$0xff] %v1292_v60 }
  0xca   :  { %v296_v31 = vpop.f32.mrf.mxu0  ;;  %v1239_v32 = vpop.f32.mrf.mxu1 }
  0xcb   :  { %675 = vst [vmem:[#allocation10 + $0x20] sm:$0xff] %v296_v31  ;;  %v1241_v33 = vadd.f32 %v738_v27, %v296_v31  ;;  %v806_v34 = vmul.f32 %v296_v31, %v296_v31  ;;  %v1266_v48 = vpop.f32.mrf.mxu2  ;;  %v1301_v0 = vpop.f32.mrf.mxu3 }
  0xcc   :  { %691 = vst [vmem:[#allocation10 + $0xa0] sm:$0xff] %v1239_v32 }
  0xcd   :  { %v1246_v36 = vadd.f32 %v868_v29, %v806_v34  ;;  %706 = vst [vmem:[#allocation10 + $0x118] sm:$0xff] %v1266_v48 }
  0xce   :  { %722 = vst [vmem:[#allocation10 + $0x198] sm:$0xff] %v1301_v0 }
  0xd2   :  { %v1249_v38 = vpop.f32.mrf.mxu0  ;;  %v1251_v39 = vpop.f32.mrf.mxu1 }
  0xd3   :  { %676 = vst [vmem:[#allocation10 + $0x28] sm:$0xff] %v1249_v38  ;;  %v1272_v51 = vpop.f32.mrf.mxu2  ;;  %v1310_v4 = vpop.f32.mrf.mxu3  ;;  %v807_v5 = vmul.f32 %v1249_v38, %v1249_v38  ;;  %v740_v6 = vadd.f32 %v1241_v33, %v1249_v38 }
  0xd4   :  { %692 = vst [vmem:[#allocation10 + $0xa8] sm:$0xff] %v1251_v39 }
  0xd5   :  { %707 = vst [vmem:[#allocation10 + $0x120] sm:$0xff] %v1272_v51  ;;  %v870_v9 = vadd.f32 %v1246_v36, %v807_v5 }
  0xd6   :  { %723 = vst [vmem:[#allocation10 + $0x1a0] sm:$0xff] %v1310_v4 }
  0xda   :  { %v302_v42 = vpop.f32.mrf.mxu0  ;;  %v1258_v43 = vpop.f32.mrf.mxu1 }
  0xdb   :  { %677 = vst [vmem:[#allocation10 + $0x30] sm:$0xff] %v302_v42  ;;  %v1281_v55 = vpop.f32.mrf.mxu2  ;;  %v808_v8 = vmul.f32 %v302_v42, %v302_v42  ;;  %v741_v10 = vadd.f32 %v740_v6, %v302_v42  ;;  %v1324_v20 = vpop.f32.mrf.mxu3 }
  0xdc   :  { %693 = vst [vmem:[#allocation10 + $0xb0] sm:$0xff] %v1258_v43 }
  0xdd   :  { %708 = vst [vmem:[#allocation10 + $0x128] sm:$0xff] %v1281_v55  ;;  %v871_v15 = vadd.f32 %v870_v9, %v808_v8 }
  0xde   :  { %724 = vst [vmem:[#allocation10 + $0x1a8] sm:$0xff] %v1324_v20 }
  0xe2   :  { %v305_v46 = vpop.f32.mrf.mxu0  ;;  %v1264_v47 = vpop.f32.mrf.mxu1 }
  0xe3   :  { %678 = vst [vmem:[#allocation10 + $0x38] sm:$0xff] %v305_v46  ;;  %v1290_v59 = vpop.f32.mrf.mxu2  ;;  %v809_v12 = vmul.f32 %v305_v46, %v305_v46  ;;  %v742_v16 = vadd.f32 %v741_v10, %v305_v46  ;;  %v1333_v41 = vpop.f32.mrf.mxu3 }
  0xe4   :  { %694 = vst [vmem:[#allocation10 + $0xb8] sm:$0xff] %v1264_v47 }
  0xe5   :  { %709 = vst [vmem:[#allocation10 + $0x130] sm:$0xff] %v1290_v59  ;;  %v872_v21 = vadd.f32 %v871_v15, %v809_v12 }
  0xe6   :  { %725 = vst [vmem:[#allocation10 + $0x1b0] sm:$0xff] %v1333_v41 }
  0xea   :  { %v308_v49 = vpop.f32.mrf.mxu0  ;;  %v1270_v50 = vpop.f32.mrf.mxu1 }
  0xeb   :  { %679 = vst [vmem:[#allocation10 + $0x40] sm:$0xff] %v308_v49  ;;  %v1299_v63 = vpop.f32.mrf.mxu2  ;;  %v810_v17 = vmul.f32 %v308_v49, %v308_v49  ;;  %v743_v22 = vadd.f32 %v742_v16, %v308_v49  ;;  %v818_v16 = vmul.f32 %v1227_v7, %v1227_v7 }
  0xec   :  { %695 = vst [vmem:[#allocation10 + $0xc0] sm:$0xff] %v1270_v50 }
  0xed   :  { %710 = vst [vmem:[#allocation10 + $0x138] sm:$0xff] %v1299_v63  ;;  %v873_v24 = vadd.f32 %v872_v21, %v810_v17  ;;  %v819_v21 = vmul.f32 %v1230_v11, %v1230_v11 }
  0xf2   :  { %v311_v53 = vpop.f32.mrf.mxu0  ;;  %v1279_v54 = vpop.f32.mrf.mxu1 }
  0xf3   :  { %680 = vst [vmem:[#allocation10 + $0x48] sm:$0xff] %v311_v53  ;;  %v1308_v3 = vpop.f32.mrf.mxu2  ;;  %v811_v23 = vmul.f32 %v311_v53, %v311_v53  ;;  %v744_v25 = vadd.f32 %v743_v22, %v311_v53 }
  0xf4   :  { %696 = vst [vmem:[#allocation10 + $0xc8] sm:$0xff] %v1279_v54 }
  0xf5   :  { %711 = vst [vmem:[#allocation10 + $0x140] sm:$0xff] %v1308_v3  ;;  %v874_v28 = vadd.f32 %v873_v24, %v811_v23  ;;  %v820_v24 = vmul.f32 %v1233_v19, %v1233_v19 }
  0xfa   :  { %v314_v57 = vpop.f32.mrf.mxu0  ;;  %v1288_v58 = vpop.f32.mrf.mxu1 }
  0xfb   :  { %681 = vst [vmem:[#allocation10 + $0x50] sm:$0xff] %v314_v57  ;;  %v1322_v18 = vpop.f32.mrf.mxu2  ;;  %v812_v27 = vmul.f32 %v314_v57, %v314_v57  ;;  %v745_v29 = vadd.f32 %v744_v25, %v314_v57 }
  0xfc   :  { %697 = vst [vmem:[#allocation10 + $0xd0] sm:$0xff] %v1288_v58 }
  0xfd   :  { %712 = vst [vmem:[#allocation10 + $0x148] sm:$0xff] %v1322_v18  ;;  %v875_v34 = vadd.f32 %v874_v28, %v812_v27 }
 0x102   :  { %v317_v61 = vpop.f32.mrf.mxu0  ;;  %v1297_v62 = vpop.f32.mrf.mxu1 }
 0x103   :  { %682 = vst [vmem:[#allocation10 + $0x58] sm:$0xff] %v317_v61  ;;  %v813_v30 = vmul.f32 %v317_v61, %v317_v61  ;;  %v746_v36 = vadd.f32 %v745_v29, %v317_v61  ;;  %v1331_v38 = vpop.f32.mrf.mxu2 }
 0x104   :  { %698 = vst [vmem:[#allocation10 + $0xd8] sm:$0xff] %v1297_v62 }
 0x105   :  { %v876_v42 = vadd.f32 %v875_v34, %v813_v30  ;;  %713 = vst [vmem:[#allocation10 + $0x150] sm:$0xff] %v1331_v38 }
 0x10a   :  { %v320_v1 = vpop.f32.mrf.mxu0  ;;  %v1306_v2 = vpop.f32.mrf.mxu1 }
 0x10b   :  { %683 = vst [vmem:[#allocation10 + $0x60] sm:$0xff] %v320_v1  ;;  %v814_v37 = vmul.f32 %v320_v1, %v320_v1  ;;  %v747_v45 = vadd.f32 %v746_v36, %v320_v1  ;;  %v1340_v15 = vpop.f32.mrf.mxu2  ;;  %v1342_v1 = vpop.f32.mrf.mxu3 }
 0x10c   :  { %699 = vst [vmem:[#allocation10 + $0xe0] sm:$0xff] %v1306_v2 }
 0x10d   :  { %v877_v49 = vadd.f32 %v876_v42, %v814_v37  ;;  %714 = vst [vmem:[#allocation10 + $0x158] sm:$0xff] %v1340_v15  ;;  %v824_v42 = vmul.f32 %v1258_v43, %v1258_v43 }
 0x10e   :  { %726 = vst [vmem:[#allocation10 + $0x1b8] sm:$0xff] %v1342_v1 }
 0x112   :  { %v323_v13 = vpop.f32.mrf.mxu0  ;;  %v1320_v14 = vpop.f32.mrf.mxu1 }
 0x113   :  { %684 = vst [vmem:[#allocation10 + $0x68] sm:$0xff] %v323_v13  ;;  %v815_v46 = vmul.f32 %v323_v13, %v323_v13  ;;  %v748_v53 = vadd.f32 %v747_v45, %v323_v13  ;;  %v1359_v30 = vpop.f32.mrf.mxu2 }
 0x114   :  { %700 = vst [vmem:[#allocation10 + $0xe8] sm:$0xff] %v1320_v14 }
 0x115   :  { %v878_v5 = vadd.f32 %v877_v49, %v815_v46  ;;  %715 = vst [vmem:[#allocation10 + $0x160] sm:$0xff] %v1359_v30  ;;  %v825_v49 = vmul.f32 %v1264_v47, %v1264_v47 }
 0x11a   :  { %v326_v31 = vpop.f32.mrf.mxu0  ;;  %v1329_v33 = vpop.f32.mrf.mxu1 }
 0x11b   :  { %685 = vst [vmem:[#allocation10 + $0x70] sm:$0xff] %v326_v31  ;;  %v816_v57 = vmul.f32 %v326_v31, %v326_v31  ;;  %v749_v61 = vadd.f32 %v748_v53, %v326_v31  ;;  %v1361_v31 = vpop.f32.mrf.mxu3 }
 0x11c   :  { %701 = vst [vmem:[#allocation10 + $0xf0] sm:$0xff] %v1329_v33 }
 0x11d   :  { %v879_v9 = vadd.f32 %v878_v5, %v816_v57  ;;  %727 = vst [vmem:[#allocation10 + $0x1c0] sm:$0xff] %v1361_v31  ;;  %v1377_v57 = vpop.f32.mrf.mxu2 }
 0x11e   :  { %716 = vst [vmem:[#allocation10 + $0x168] sm:$0xff] %v1377_v57 }
 0x122   :  { %v329_v6 = vpop.f32.mrf.mxu0  ;;  %v1338_v8 = vpop.f32.mrf.mxu1 }
 0x123   :  { %686 = vst [vmem:[#allocation10 + $0x78] sm:$0xff] %v329_v6  ;;  %v750_v10 = vadd.f32 %v749_v61, %v329_v6  ;;  %v817_v12 = vmul.f32 %v329_v6, %v329_v6  ;;  %v1379_v5 = vpop.f32.mrf.mxu3 }
 0x124   :  { %702 = vst [vmem:[#allocation10 + $0xf8] sm:$0xff] %v1338_v8 }
 0x125   :  { %v751_v13 = vadd.f32 %v750_v10, %v1227_v7  ;;  %v880_v17 = vadd.f32 %v879_v9, %v817_v12  ;;  %v821_v7 = vmul.f32 %v1236_v26, %v1236_v26  ;;  %728 = vst [vmem:[#allocation10 + $0x1c8] sm:$0xff] %v1379_v5  ;;  %v828_v10 = vmul.f32 %v1288_v58, %v1288_v58 }
 0x127   :  { %v752_v22 = vadd.f32 %v751_v13, %v1230_v11  ;;  %v881_v23 = vadd.f32 %v880_v17, %v818_v16  ;;  %v822_v11 = vmul.f32 %v1239_v32, %v1239_v32 }
 0x129   :  { %v753_v25 = vadd.f32 %v752_v22, %v1233_v19  ;;  %v882_v27 = vadd.f32 %v881_v23, %v819_v21  ;;  %v823_v19 = vmul.f32 %v1251_v39, %v1251_v39  ;;  %v1395_v21 = vpop.f32.mrf.mxu2 }
 0x12a   :  { %717 = vst [vmem:[#allocation10 + $0x170] sm:$0xff] %v1395_v21 }
 0x12b   :  { %v754_v28 = vadd.f32 %v753_v25, %v1236_v26  ;;  %v883_v29 = vadd.f32 %v882_v27, %v820_v24  ;;  %v1397_v22 = vpop.f32.mrf.mxu3  ;;  %v830_v24 = vmul.f32 %v1306_v2, %v1306_v2 }
 0x12c   :  { %729 = vst [vmem:[#allocation10 + $0x1d0] sm:$0xff] %v1397_v22 }
 0x12d   :  { %v755_v34 = vadd.f32 %v754_v28, %v1239_v32  ;;  %v884_v36 = vadd.f32 %v883_v29, %v821_v7  ;;  %v832_v28 = vmul.f32 %v1329_v33, %v1329_v33  ;;  %v833_v29 = vmul.f32 %v1338_v8, %v1338_v8 }
 0x12f   :  { %v756_v26 = vadd.f32 %v755_v34, %v1251_v39  ;;  %v885_v37 = vadd.f32 %v884_v36, %v822_v11  ;;  %v826_v39 = vmul.f32 %v1270_v50, %v1270_v50 }
 0x131   :  { %v886_v45 = vadd.f32 %v885_v37, %v823_v19  ;;  %v757_v46 = vadd.f32 %v756_v26, %v1258_v43  ;;  %v827_v43 = vmul.f32 %v1279_v54, %v1279_v54  ;;  %v425_v34 = vpop.f32.mrf.mxu2  ;;  %v834_v19 = vmul.f32 %v1243_v35, %v1243_v35 }
 0x132   :  { %718 = vst [vmem:[#allocation10 + $0x178] sm:$0xff] %v425_v34 }
 0x133   :  { %v758_v32 = vadd.f32 %v757_v46, %v1264_v47  ;;  %v887_v53 = vadd.f32 %v886_v45, %v824_v42  ;;  %v1413_v36 = vpop.f32.mrf.mxu3 }
 0x134   :  { %730 = vst [vmem:[#allocation10 + $0x1d8] sm:$0xff] %v1413_v36 }
 0x135   :  { %v759_v61 = vadd.f32 %v758_v32, %v1270_v50  ;;  %v888_v6 = vadd.f32 %v887_v53, %v825_v49  ;;  %v829_v50 = vmul.f32 %v1297_v62, %v1297_v62  ;;  %v837_v49 = vmul.f32 %v1266_v48, %v1266_v48 }
 0x137   :  { %v760_v47 = vadd.f32 %v759_v61, %v1279_v54  ;;  %v889_v9 = vadd.f32 %v888_v6, %v826_v39 }
 0x139   :  { %v761_v12 = vadd.f32 %v760_v47, %v1288_v58  ;;  %v890_v16 = vadd.f32 %v889_v9, %v827_v43 }
 0x13b   :  { %v762_v13 = vadd.f32 %v761_v12, %v1297_v62  ;;  %v891_v17 = vadd.f32 %v890_v16, %v828_v10  ;;  %v831_v62 = vmul.f32 %v1320_v14, %v1320_v14  ;;  %v1428_v53 = vpop.f32.mrf.mxu3  ;;  %v841_v10 = vmul.f32 %v1299_v63, %v1299_v63 }
 0x13c   :  { %731 = vst [vmem:[#allocation10 + $0x1e0] sm:$0xff] %v1428_v53 }
 0x13d   :  { %v892_v54 = vadd.f32 %v891_v17, %v829_v50  ;;  %v763_v23 = vadd.f32 %v762_v13, %v1306_v2  ;;  %v843_v17 = vmul.f32 %v1322_v18, %v1322_v18 }
 0x13f   :  { %v893_v58 = vadd.f32 %v892_v54, %v830_v24  ;;  %v764_v25 = vadd.f32 %v763_v23, %v1320_v14 }
 0x141   :  { %v894_v27 = vadd.f32 %v893_v58, %v831_v62  ;;  %v765_v7 = vadd.f32 %v764_v25, %v1329_v33  ;;  %v835_v33 = vmul.f32 %v1254_v40, %v1254_v40  ;;  %v845_v25 = vmul.f32 %v1340_v15, %v1340_v15 }
 0x143   :  { %v895_v11 = vadd.f32 %v894_v27, %v832_v28  ;;  %v766_v2 = vadd.f32 %v765_v7, %v1338_v8  ;;  %v836_v8 = vmul.f32 %v1260_v44, %v1260_v44  ;;  %v846_v7 = vmul.f32 %v1359_v30, %v1359_v30 }
 0x145   :  { %v767_v14 = vadd.f32 %v766_v2, %v1243_v35  ;;  %v896_v26 = vadd.f32 %v895_v11, %v833_v29  ;;  %v847_v29 = vmul.f32 %v1377_v57, %v1377_v57  ;;  %v848_v2 = vmul.f32 %v1395_v21, %v1395_v21 }
 0x147   :  { %v768_v37 = vadd.f32 %v767_v14, %v1254_v40  ;;  %v897_v42 = vadd.f32 %v896_v26, %v834_v19  ;;  %v838_v40 = vmul.f32 %v1272_v51, %v1272_v51  ;;  %v849_v19 = vmul.f32 %v425_v34, %v425_v34 }
 0x149   :  { %v769_v45 = vadd.f32 %v768_v37, %v1260_v44  ;;  %v898_v46 = vadd.f32 %v897_v42, %v835_v33  ;;  %v839_v44 = vmul.f32 %v1281_v55, %v1281_v55 }
 0x14b   :  { %v770_v35 = vadd.f32 %v769_v45, %v1266_v48  ;;  %v899_v32 = vadd.f32 %v898_v46, %v836_v8  ;;  %v840_v48 = vmul.f32 %v1290_v59, %v1290_v59 }
 0x14d   :  { %v771_v39 = vadd.f32 %v770_v35, %v1272_v51  ;;  %v900_v61 = vadd.f32 %v899_v32, %v837_v49  ;;  %v1443_v51 = vpop.f32.mrf.mxu3  ;;  %v854_v32 = vmul.f32 %v1310_v4, %v1310_v4 }
 0x14e   :  { %732 = vst [vmem:[#allocation10 + $0x1e8] sm:$0xff] %v1443_v51 }
 0x14f   :  { %v772_v6 = vadd.f32 %v771_v39, %v1281_v55  ;;  %v901_v43 = vadd.f32 %v900_v61, %v838_v40  ;;  %v842_v55 = vmul.f32 %v1308_v3, %v1308_v3 }
 0x151   :  { %v902_v47 = vadd.f32 %v901_v43, %v839_v44  ;;  %v773_v9 = vadd.f32 %v772_v6, %v1290_v59 }
 0x153   :  { %v774_v12 = vadd.f32 %v773_v9, %v1299_v63  ;;  %v903_v16 = vadd.f32 %v902_v47, %v840_v48  ;;  %v844_v63 = vmul.f32 %v1331_v38, %v1331_v38 }
 0x155   :  { %v775_v13 = vadd.f32 %v774_v12, %v1308_v3  ;;  %v904_v50 = vadd.f32 %v903_v16, %v841_v10  ;;  %v1458_v3 = vpop.f32.mrf.mxu3 }
 0x156   :  { %733 = vst [vmem:[#allocation10 + $0x1f0] sm:$0xff] %v1458_v3 }
 0x157   :  { %v776_v59 = vadd.f32 %v775_v13, %v1322_v18  ;;  %v905_v54 = vadd.f32 %v904_v50, %v842_v55  ;;  %v861_v50 = vmul.f32 %v1413_v36, %v1413_v36 }
 0x159   :  { %v777_v23 = vadd.f32 %v776_v59, %v1331_v38  ;;  %v906_v24 = vadd.f32 %v905_v54, %v843_v17  ;;  %v862_v54 = vmul.f32 %v1428_v53, %v1428_v53 }
 0x15b   :  { %v778_v58 = vadd.f32 %v777_v23, %v1340_v15  ;;  %v907_v62 = vadd.f32 %v906_v24, %v844_v63  ;;  %v863_v23 = vmul.f32 %v1443_v51, %v1443_v51 }
 0x15d   :  { %v908_v27 = vadd.f32 %v907_v62, %v845_v25  ;;  %v779_v18 = vadd.f32 %v778_v58, %v1359_v30  ;;  %v473_v26 = vpop.f32.mrf.mxu3  ;;  %v864_v58 = vmul.f32 %v1458_v3, %v1458_v3 }
 0x15e   :  { %734 = vst [vmem:[#allocation10 + $0x1f8] sm:$0xff] %v473_v26 }
 0x15f   :  { %v909_v28 = vadd.f32 %v908_v27, %v846_v7  ;;  %v780_v38 = vadd.f32 %v779_v18, %v1377_v57  ;;  %v850_v57 = vmul.f32 %v1274_v52, %v1274_v52  ;;  %961 = dma.vmem_to_hbm [thread:$0]  %s954_s1, 8192, %s956_s29, [#allocation7], %s1184_s23, %s1184_s23, %s1185_s24  }
 0x161   :  { %v910_v15 = vadd.f32 %v909_v28, %v847_v29  ;;  %v781_v11 = vadd.f32 %v780_v38, %v1395_v21  ;;  %v851_v21 = vmul.f32 %v1283_v56, %v1283_v56 }
 0x163   :  { %v911_v30 = vadd.f32 %v910_v15, %v848_v2  ;;  %v782_v14 = vadd.f32 %v781_v11, %v425_v34  ;;  %v852_v34 = vmul.f32 %v1292_v60, %v1292_v60 }
 0x165   :  { %v783_v33 = vadd.f32 %v782_v14, %v1274_v52  ;;  %v912_v37 = vadd.f32 %v911_v30, %v849_v19  ;;  %v853_v52 = vmul.f32 %v1301_v0, %v1301_v0 }
 0x167   :  { %v784_v42 = vadd.f32 %v783_v33, %v1283_v56  ;;  %v913_v8 = vadd.f32 %v912_v37, %v850_v57  ;;  %v855_v56 = vmul.f32 %v1324_v20, %v1324_v20 }
 0x169   :  { %v785_v45 = vadd.f32 %v784_v42, %v1292_v60  ;;  %v914_v46 = vadd.f32 %v913_v8, %v851_v21  ;;  %v856_v60 = vmul.f32 %v1333_v41, %v1333_v41 }
 0x16b   :  { %v786_v49 = vadd.f32 %v785_v45, %v1301_v0  ;;  %v915_v35 = vadd.f32 %v914_v46, %v852_v34  ;;  %v857_v0 = vmul.f32 %v1342_v1, %v1342_v1 }
 0x16d   :  { %v787_v40 = vadd.f32 %v786_v49, %v1310_v4  ;;  %v916_v39 = vadd.f32 %v915_v35, %v853_v52  ;;  %v858_v4 = vmul.f32 %v1361_v31, %v1361_v31 }
 0x16f   :  { %v788_v61 = vadd.f32 %v787_v40, %v1324_v20  ;;  %v917_v44 = vadd.f32 %v916_v39, %v854_v32  ;;  %v859_v20 = vmul.f32 %v1379_v5, %v1379_v5 }
 0x171   :  { %v918_v6 = vadd.f32 %v917_v44, %v855_v56  ;;  %v789_v43 = vadd.f32 %v788_v61, %v1333_v41  ;;  %v860_v41 = vmul.f32 %v1397_v22, %v1397_v22 }
 0x173   :  { %v790_v48 = vadd.f32 %v789_v43, %v1342_v1  ;;  %v919_v47 = vadd.f32 %v918_v6, %v856_v60 }
 0x175   :  { %v791_v9 = vadd.f32 %v790_v48, %v1361_v31  ;;  %v920_v10 = vadd.f32 %v919_v47, %v857_v0 }
 0x177   :  { %v792_v12 = vadd.f32 %v791_v9, %v1379_v5  ;;  %v921_v16 = vadd.f32 %v920_v10, %v858_v4 }
 0x179   :  { %v793_v55 = vadd.f32 %v792_v12, %v1397_v22  ;;  %v922_v13 = vadd.f32 %v921_v16, %v859_v20 }
 0x17b   :  { %v794_v1 = vadd.f32 %v793_v55, %v1413_v36  ;;  %v923_v17 = vadd.f32 %v922_v13, %v860_v41  ;;  %v865_v36 = vmul.f32 %v473_v26, %v473_v26 }
 0x17d   :  { %v924_v31 = vadd.f32 %v923_v17, %v861_v50  ;;  %v795_v59 = vadd.f32 %v794_v1, %v1428_v53 }
 0x17f   :  { %v925_v5 = vadd.f32 %v924_v31, %v862_v54  ;;  %v796_v63 = vadd.f32 %v795_v59, %v1443_v51 }
 0x181   :  { %v926_v22 = vadd.f32 %v925_v5, %v863_v23  ;;  %v797_v24 = vadd.f32 %v796_v63, %v1458_v3 }
 0x183   :  { %v927_v25 = vadd.f32 %v926_v22, %v864_v58  ;;  %v798_v62 = vadd.f32 %v797_v24, %v473_v26 }
 0x185   :  { %v928_v27 = vadd.f32 %v927_v25, %v865_v36  ;;  %v934_v18 = vrot.slane %v798_v62, 4 }
 0x187   :  { %v935_v7 = vadd.f32 %v934_v18, %v798_v62  ;;  %v942_v28 = vrot.slane %v928_v27, 4 }
 0x189   :  { %v936_v53 = vrot.slane %v935_v7, 2  ;;  %v943_v38 = vadd.f32 %v942_v28, %v928_v27 }
 0x18b   :  { %v937_v29 = vadd.f32 %v936_v53, %v935_v7  ;;  %v944_v15 = vrot.slane %v943_v38, 2 }
 0x18d   :  { %v945_v51 = vadd.f32 %v944_v15, %v943_v38  ;;  %v938_v11 = vrot.slane %v937_v29, 1 }
 0x18f   :  { %v939_v3 = vadd.f32 %v938_v11, %v937_v29  ;;  %v946_v2 = vrot.slane %v945_v51, 1 }
 0x191   :  { %940 = vst [vmem:[#allocation11] sm:$0x1] %v939_v3  ;;  %v947_v19 = vadd.f32 %v946_v2, %v945_v51 }
 0x192   :  { %972 = dma.vmem_to_hbm [thread:$0]  %s968_s30, 16, %s970_s7, [#allocation12]  }
 0x193   :  { %948 = vst [vmem:[#allocation13] sm:$0x1] %v947_v19 }
 0x194   :  { %983 = dma.vmem_to_hbm [thread:$0]  %s979_s9, 16, %s981_s12, [#allocation12]  }
 0x195   :  { %1179 = dma.done.wait [#allocation7], 8192  }
 0x196   :  { %1180 = vsyncadd [#allocation7], 4294959104 }
 0x197   :  { %1181 = dma.done.wait [#allocation12], 32  }
 0x198   :  { %1182 = vsyncadd [#allocation12], 4294967264 }
 0x199   :  { %996 = vsyncpa [#allocation6], 1 }
 0x19a   :  { %997 = vsyncpa [#allocation9], 1 }
 0x19b   :  { %998 = vsyncpa [#allocation7], 1 }
 0x19c   :  { %999 = vsyncpa [#allocation12], 1 }

</bundles_post_ra>
